<compile_context>
chip_gen: v7x
topology: tpu7x:2x2x1
jax: 0.10.0
libtpu: 0.0.40
codegen_flags: <defaults>
</compile_context>

<pallas_src>
import jax
import jax.numpy as jnp
from jax.experimental import pallas as pl
from jax.experimental.pallas import tpu as pltpu

HIDDEN = 100
HIDDEN_PAD = 128   # lane/sublane-aligned hidden size
LANES = 128        # batch lanes per row


def completor_kernel(x_ref, w1_ref, b1_ref, w2_ref, b2_ref, o_ref):
    # x_ref / o_ref : [TM, 128]      batch tile, lane-dense
    # w1_ref, b1_ref: [HIDDEN_PAD, 1] (hidden on sublanes)
    # w2_ref        : [1, HIDDEN_PAD]
    # b2_ref        : [1, 1]
    w1c = w1_ref[...]
    b1c = b1_ref[...]
    w2r = w2_ref[...]
    b2 = b2_ref[...]                      # [1, 1], broadcasts over [1, 128]

    tm = x_ref.shape[0]

    @pl.loop(0, tm)
    def _(r):
        x_row = x_ref[pl.ds(r, 1), :]                                 # [1, 128]
        # Layer 1 on the VPU: rank-1 broadcast FMA + ReLU (hidden x batch).
        hT = jnp.maximum(w1c * x_row + b1c, 0.0)                      # [HP, 128]
        # Layer 2 on the MXU: lane-dense output row.
        yT = jnp.dot(w2r, hT, preferred_element_type=jnp.float32)     # [1, 128]
        o_ref[pl.ds(r, 1), :] = yT + b2


def prepare_params(w1, b1, w2, b2):
    """Pad / lay out the PyTorch-style params ONCE (hoisted out of forward).

    Accepts w1 as [1,100] or [100,1] (fan_in=1), b1 [100], w2 [100,1] or
    [1,100], b2 [1]."""
    w1c = jnp.zeros((HIDDEN_PAD, 1), jnp.float32).at[:HIDDEN, 0].set(
        jnp.asarray(w1, jnp.float32).reshape(HIDDEN))
    b1c = jnp.zeros((HIDDEN_PAD, 1), jnp.float32).at[:HIDDEN, 0].set(
        jnp.asarray(b1, jnp.float32).reshape(HIDDEN))
    w2r = jnp.zeros((1, HIDDEN_PAD), jnp.float32).at[0, :HIDDEN].set(
        jnp.asarray(w2, jnp.float32).reshape(HIDDEN))
    b2m = jnp.asarray(b2, jnp.float32).reshape(1, 1)
    return w1c, b1c, w2r, b2m


def completor_forward(x, padded_params, block_rows=512):
    """x: [N, 1] (or [N]) f32. Returns [N, 1] f32."""
    w1c, b1c, w2r, b2m = padded_params
    n = x.shape[0]

    rows = -(-n // LANES)                          # ceil(N / 128)
    tm = min(block_rows, ((rows + 7) // 8) * 8)    # tile rows, multiple of 8
    rows_p = ((rows + tm - 1) // tm) * tm          # pad rows to a tile multiple
    n_p = rows_p * LANES

    xf = jnp.zeros((n_p,), jnp.float32).at[:n].set(
        x.reshape(n).astype(jnp.float32))
    x2 = xf.reshape(rows_p, LANES)                 # lane-dense batch layout

    out2 = pl.pallas_call(
        completor_kernel,
        out_shape=jax.ShapeDtypeStruct((rows_p, LANES), jnp.float32),
        grid=(rows_p // tm,),
        in_specs=[
            pl.BlockSpec((tm, LANES), lambda i: (i, 0)),          # x tile
            pl.BlockSpec((HIDDEN_PAD, 1), lambda i: (0, 0)),      # w1 (resident)
            pl.BlockSpec((HIDDEN_PAD, 1), lambda i: (0, 0)),      # b1
            pl.BlockSpec((1, HIDDEN_PAD), lambda i: (0, 0)),      # w2
            pl.BlockSpec((1, 1), lambda i: (0, 0)),               # b2
        ],
        out_specs=pl.BlockSpec((tm, LANES), lambda i: (i, 0)),
        compiler_params=pltpu.CompilerParams(
            dimension_semantics=("parallel",)),
    )(x2, w1c, b1c, w2r, b2m)

    return out2.reshape(n_p, 1)[:n]


def init_params(key):
    """Deterministic init mimicking PyTorch nn.Linear default U(+-1/sqrt(fan_in))."""
    k1, k2, k3, k4 = jax.random.split(key, 4)
    bound1 = 1.0  # fan_in = 1
    w1 = jax.random.uniform(k1, (1, HIDDEN), jnp.float32, -bound1, bound1)
    b1 = jax.random.uniform(k2, (HIDDEN,), jnp.float32, -bound1, bound1)
    bound2 = 1.0 / jnp.sqrt(float(HIDDEN))
    w2 = jax.random.uniform(k3, (HIDDEN, 1), jnp.float32, -bound2, bound2)
    b2 = jax.random.uniform(k4, (1,), jnp.float32, -bound2, bound2)
    return w1, b1, w2, b2


if __name__ == "__main__":
    key = jax.random.PRNGKey(0)
    kx, kp = jax.random.split(key)

    N = 300  # small, non-multiple of 128 to exercise padding/tiling
    x = jax.random.normal(kx, (N, 1), jnp.float32)
    w1, b1, w2, b2 = init_params(kp)

    padded = prepare_params(w1, b1, w2, b2)   # padded once, outside forward
    out = completor_forward(x, padded)
    out = jax.block_until_ready(out)

    # Pure-JAX reference (elementwise layer 1, f32 reduce for layer 2).
    h_ref = jnp.maximum(x * w1.reshape(1, HIDDEN) + b1[None, :], 0.0)
    ref = (h_ref * w2.reshape(1, HIDDEN)).sum(axis=1, keepdims=True) + b2[None, :]

    assert out.shape == (N, 1)
    assert jnp.allclose(out, ref, atol=1e-4, rtol=1e-4), (
        float(jnp.max(jnp.abs(out - ref))))
    print("KERNEL_OK")
</pallas_src>

<mosaic_0001>
module attributes {stable_mosaic.version = 11 : i64} {
  func.func @completor_kernel(%arg0: i32, %arg1: memref<8x128xf32, #tpu.memory_space<vmem>>, %arg2: memref<128x1xf32, #tpu.memory_space<vmem>>, %arg3: memref<128x1xf32, #tpu.memory_space<vmem>>, %arg4: memref<1x128xf32, #tpu.memory_space<vmem>>, %arg5: memref<1x1xf32, #tpu.memory_space<vmem>>, %arg6: memref<8x128xf32, #tpu.memory_space<vmem>>) attributes {dimension_semantics = [#tpu.dimension_semantics<parallel>], iteration_bounds = array<i64: 1>, scalar_prefetch = 0 : i64, scratch_operands = 0 : i64, tpu.core_type = #tpu.core_type<tc>, window_params = [{transform_indices = @transform_0, window_bounds = array<i64: 8, 128>}, {pipeline_mode = #tpu.pipeline_mode<synchronous>, transform_indices = @transform_1, window_bounds = array<i64: 128, 1>}, {pipeline_mode = #tpu.pipeline_mode<synchronous>, transform_indices = @transform_2, window_bounds = array<i64: 128, 1>}, {pipeline_mode = #tpu.pipeline_mode<synchronous>, transform_indices = @transform_3, window_bounds = array<i64: 1, 128>}, {pipeline_mode = #tpu.pipeline_mode<synchronous>, transform_indices = @transform_4, window_bounds = array<i64: 1, 1>}, {transform_indices = @transform_5, window_bounds = array<i64: 8, 128>}]} {
    %c0 = arith.constant 0 : index
    %c0_0 = arith.constant 0 : index
    %0 = vector.load %arg2[%c0, %c0_0] : memref<128x1xf32, #tpu.memory_space<vmem>>, vector<128x1xf32>
    %c0_1 = arith.constant 0 : index
    %c0_2 = arith.constant 0 : index
    %1 = vector.load %arg3[%c0_1, %c0_2] : memref<128x1xf32, #tpu.memory_space<vmem>>, vector<128x1xf32>
    %c0_3 = arith.constant 0 : index
    %c0_4 = arith.constant 0 : index
    %2 = vector.load %arg4[%c0_3, %c0_4] : memref<1x128xf32, #tpu.memory_space<vmem>>, vector<1x128xf32>
    %c0_5 = arith.constant 0 : index
    %c0_6 = arith.constant 0 : index
    %3 = vector.load %arg5[%c0_5, %c0_6] : memref<1x1xf32, #tpu.memory_space<vmem>>, vector<1x1xf32>
    %c0_i32 = arith.constant 0 : i32
    %c8_i32 = arith.constant 8 : i32
    %4 = arith.addi %c0_i32, %c8_i32 : i32
    %c1_i32 = arith.constant 1 : i32
    scf.for %arg7 = %c0_i32 to %4 step %c1_i32  : i32 {
      %c1_i32_8 = arith.constant 1 : i32
      %5 = arith.muli %arg7, %c1_i32_8 : i32
      %c0_i32_9 = arith.constant 0 : i32
      %6 = arith.addi %c0_i32_9, %5 : i32
      %7 = arith.index_cast %6 : i32 to index
      %c0_10 = arith.constant 0 : index
      %8 = vector.load %arg1[%7, %c0_10] : memref<8x128xf32, #tpu.memory_space<vmem>>, vector<1x128xf32>
      %9 = vector.broadcast %0 : vector<128x1xf32> to vector<128x128xf32>
      %10 = vector.broadcast %8 : vector<1x128xf32> to vector<128x128xf32>
      %11 = arith.mulf %9, %10 : vector<128x128xf32>
      %12 = vector.broadcast %1 : vector<128x1xf32> to vector<128x128xf32>
      %13 = arith.addf %11, %12 : vector<128x128xf32>
      %cst = arith.constant 0.000000e+00 : f32
      %14 = vector.broadcast %cst : f32 to vector<128x128xf32>
      %15 = arith.maximumf %13, %14 : vector<128x128xf32>
      %cst_11 = arith.constant dense<0.000000e+00> : vector<1x128xf32>
      %16 = tpu.matmul %2, %15, %cst_11 {dimension_numbers = #tpu.dot_dimension_numbers<[1], [0], [0], [1], [0, 0, 1, 1], [], []>} : vector<1x128xf32>, vector<128x128xf32>, vector<1x128xf32> -> vector<1x128xf32>
      %17 = vector.broadcast %3 : vector<1x1xf32> to vector<1x128xf32>
      %18 = arith.addf %16, %17 : vector<1x128xf32>
      %19 = arith.index_cast %6 : i32 to index
      %c0_12 = arith.constant 0 : index
      %20 = vector.load %arg6[%19, %c0_12] : memref<8x128xf32, #tpu.memory_space<vmem>>, vector<1x128xf32>
      tpu.vector_store %arg6[%19, %c0_12], %18 {strides = array<i32>} : memref<8x128xf32, #tpu.memory_space<vmem>>, vector<1x128xf32>,
    }
    %c8_i32_7 = arith.constant 8 : i32
    return
  }
  func.func @transform_0(%arg0: i32) -> (i32, i32) {
    %c0_i32 = arith.constant 0 : i32
    %c0_i32_0 = arith.constant 0 : i32
    return %arg0, %c0_i32 : i32, i32
  }
  func.func @transform_1(%arg0: i32) -> (i32, i32) {
    %c0_i32 = arith.constant 0 : i32
    %c0_i32_0 = arith.constant 0 : i32
    %c0_i32_1 = arith.constant 0 : i32
    return %c0_i32, %c0_i32_0 : i32, i32
  }
  func.func @transform_2(%arg0: i32) -> (i32, i32) {
    %c0_i32 = arith.constant 0 : i32
    %c0_i32_0 = arith.constant 0 : i32
    %c0_i32_1 = arith.constant 0 : i32
    return %c0_i32, %c0_i32_0 : i32, i32
  }
  func.func @transform_3(%arg0: i32) -> (i32, i32) {
    %c0_i32 = arith.constant 0 : i32
    %c0_i32_0 = arith.constant 0 : i32
    %c0_i32_1 = arith.constant 0 : i32
    return %c0_i32, %c0_i32_0 : i32, i32
  }
  func.func @transform_4(%arg0: i32) -> (i32, i32) {
    %c0_i32 = arith.constant 0 : i32
    %c0_i32_0 = arith.constant 0 : i32
    %c0_i32_1 = arith.constant 0 : i32
    return %c0_i32, %c0_i32_0 : i32, i32
  }
  func.func @transform_5(%arg0: i32) -> (i32, i32) {
    %c0_i32 = arith.constant 0 : i32
    %c0_i32_0 = arith.constant 0 : i32
    return %arg0, %c0_i32 : i32, i32
  }
}

</mosaic_0001>

<bundles_post_ra>
// kernel: tpu_custom_call.1
= control target key start
LH: loop header
LB: loop body
LE: loop exit
PB: predicated region body
PF: predicated region fallthrough
CT: control target
= control target key end

     0   :  { %s793_s0 = inlined_call_operand.vmem [shape: f32[8,128], index: 0, kind: input, shape index: {}]   ;;  %s794_s1 = inlined_call_operand.vmem [shape: f32[128,1], index: 1, kind: input, shape index: {}]   ;;  %s795_s2 = inlined_call_operand.vmem [shape: f32[128,1], index: 2, kind: input, shape index: {}]   ;;  %s796_s3 = inlined_call_operand.vmem [shape: f32[1,128], index: 3, kind: input, shape index: {}]   ;;  %s797_s4 = inlined_call_operand.<no memory space> [shape: f32[1,1], index: 4, kind: input, shape index: {}]   ;;  %s798_s5 = inlined_call_operand.hbm [shape: f32[8,128], index: 5, kind: output, shape index: {}]  }
   0x1   :  { %v10_v0 = vstv %s797_s4 }
   0x2   :  { %11 = vst [vmem:[#allocation2] sm:$0x1] %v10_v0 }
   0x3   :  { %12 = vsyncpa [#allocation4], 0  ;;  %v544_v1 = vld [vmem:[%s794_s1] sm:$0xff]  ;;  %v549_v2 = vld [vmem:[%s794_s1 + $0x8] sm:$0xff]  ;;  %s708_s7 = smov 0  }
   0x4   :  { %v554_v3 = vld [vmem:[%s794_s1 + $0x10] sm:$0xff]  ;;  %v559_v4 = vld [vmem:[%s794_s1 + $0x18] sm:$0xff]  ;;  %v564_v5 = vld [vmem:[%s794_s1 + $0x20] sm:$0xff] }
   0x5   :  { %v569_v6 = vld [vmem:[%s794_s1 + $0x28] sm:$0xff]  ;;  %v574_v7 = vld [vmem:[%s794_s1 + $0x30] sm:$0xff]  ;;  %v579_v8 = vld [vmem:[%s794_s1 + $0x38] sm:$0xff] }
   0x6   :  { %v584_v9 = vld [vmem:[%s794_s1 + $0x40] sm:$0xff]  ;;  %v589_v10 = vld [vmem:[%s794_s1 + $0x48] sm:$0xff]  ;;  %v594_v11 = vld [vmem:[%s794_s1 + $0x50] sm:$0xff] }
   0x7   :  { %v599_v12 = vld [vmem:[%s794_s1 + $0x58] sm:$0xff]  ;;  %v604_v13 = vld [vmem:[%s794_s1 + $0x60] sm:$0xff]  ;;  %v609_v14 = vld [vmem:[%s794_s1 + $0x68] sm:$0xff] }
   0x8   :  { %v614_v15 = vld [vmem:[%s794_s1 + $0x70] sm:$0xff]  ;;  %v619_v16 = vld [vmem:[%s794_s1 + $0x78] sm:$0xff]  ;;  %v624_v17 = vld [vmem:[%s795_s2] sm:$0xff] }
   0x9   :  { %v629_v18 = vld [vmem:[%s795_s2 + $0x8] sm:$0xff]  ;;  %v634_v19 = vld [vmem:[%s795_s2 + $0x10] sm:$0xff]  ;;  %v639_v20 = vld [vmem:[%s795_s2 + $0x18] sm:$0xff] }
   0xa   :  { %v644_v21 = vld [vmem:[%s795_s2 + $0x20] sm:$0xff]  ;;  %v649_v22 = vld [vmem:[%s795_s2 + $0x28] sm:$0xff]  ;;  %v654_v23 = vld [vmem:[%s795_s2 + $0x30] sm:$0xff] }
   0xb   :  { %v659_v24 = vld [vmem:[%s795_s2 + $0x38] sm:$0xff]  ;;  %v664_v25 = vld [vmem:[%s795_s2 + $0x40] sm:$0xff]  ;;  %v669_v26 = vld [vmem:[%s795_s2 + $0x48] sm:$0xff] }
   0xc   :  { %v674_v27 = vld [vmem:[%s795_s2 + $0x50] sm:$0xff]  ;;  %v679_v28 = vld [vmem:[%s795_s2 + $0x58] sm:$0xff]  ;;  %v684_v29 = vld [vmem:[%s795_s2 + $0x60] sm:$0xff] }
   0xd   :  { %v689_v30 = vld [vmem:[%s795_s2 + $0x68] sm:$0xff]  ;;  %v694_v31 = vld [vmem:[%s795_s2 + $0x70] sm:$0xff]  ;;  %v699_v32 = vld [vmem:[%s795_s2 + $0x78] sm:$0xff] }
   0xe   :  { %v704_v33 = vld [vmem:[%s796_s3] sm:$0x1] }
   0xf   :  { %v706_v34 = vld [vmem:[#allocation2] sm:$0x1] }
  0x10 LB: > { %v503_v35 = vmov 0   ;;  %v504_v36 = vmov 0.0|0.0   ;;  %vm505_vm0 = vmmov 0   ;;  %v506_v37 = vmov 0.0   ;;  %s63_s1 = scalar_lea.vmem %s793_s0, %s501_s7  ;;  %s356_s8 = scalar_lea.vmem [#allocation3], %s501_s7  ;;  %s501_s7 = sphi %s708_s7, %s62_s7  }
  0x11   : > { %470 = vset.pattern.permute.xlu1 %v503_v35  ;;  %469 = vset.pattern.permute.xlu0 %v503_v35  ;;  %v751_v38 = vld [vmem:[%s63_s1] ss:$0 sm:$0xff]  ;;  %s62_s7 = sadd.s32 1, %s501_s7  }
  0x12   : > { %167 = vperm.xlu1 %470, %v624_v17   ;;  %67 = vperm.xlu0 %469, %v544_v1   ;;  %p59_p0 = scmp.ge.s32.totalorder %s62_s7, 8  }
  0x13   : > { %432 = vmatprep.subr.bf16.mxu0 %v504_v36  ;;  %429 = vmatprep.mubr.msk.f32.mxu0 %vm505_vm0, %v506_v37  ;;  %s507_s9 = smov (%p59_p0), [#allocation3]  }
  0x14   :  { %s364_s10 = sshll.u32 (%p59_p0), %s507_s9, 4  ;;  %s365_s10 = int_to_ptr.vmem [resolvable:$true] %s364_s10 }
  0x15   :  { %s471_s11 = scalar_lea.vmem (%p59_p0), %s365_s10, 128  ;;  %p476_p2 = scmp.lt.s32.totalorder (%p59_p0), %s365_s10, %s365_s10 }
  0x16   : > { %172 = vperm.xlu1 %470, %v629_v18   ;;  %72 = vperm.xlu0 %469, %v549_v2   ;;  %p472_p1 = scmp.ne.s32.totalorder (%p59_p0), %s365_s10, %s471_s11  ;;  %p477_p3 = scmp.lt.s32.totalorder (%p59_p0), %s471_s11, %s471_s11 }
  0x18   :  { %p478_p4 = por (%p59_p0), %p477_p3, %p476_p2 }
  0x1a   : > { %82 = vperm.xlu1 %470, %v559_v4   ;;  %77 = vperm.xlu0 %469, %v554_v3   ;;  %p479_p5 = pnand (%p59_p0), %p478_p4, %p472_p1 }
  0x1e   : > { %182 = vperm.xlu1 %470, %v639_v20   ;;  %177 = vperm.xlu0 %469, %v634_v19  }
  0x22   : > { %92 = vperm.xlu1 %470, %v569_v6   ;;  %87 = vperm.xlu0 %469, %v564_v5  }
  0x26   : > { %192 = vperm.xlu1 %470, %v649_v22   ;;  %187 = vperm.xlu0 %469, %v644_v21  }
  0x2a   : > { %102 = vperm.xlu1 %470, %v579_v8   ;;  %97 = vperm.xlu0 %469, %v574_v7  }
  0x2e   : > { %202 = vperm.xlu1 %470, %v659_v24   ;;  %197 = vperm.xlu0 %469, %v654_v23  }
  0x32   : > { %112 = vperm.xlu1 %470, %v589_v10   ;;  %107 = vperm.xlu0 %469, %v584_v9  }
  0x36   : > { %212 = vperm.xlu1 %470, %v669_v26   ;;  %207 = vperm.xlu0 %469, %v664_v25  }
  0x3a   : > { %122 = vperm.xlu1 %470, %v599_v12   ;;  %117 = vperm.xlu0 %469, %v594_v11  }
  0x3e   : > { %222 = vperm.xlu1 %470, %v679_v28   ;;  %217 = vperm.xlu0 %469, %v674_v27  }
  0x42   : > { %132 = vperm.xlu1 %470, %v609_v14   ;;  %127 = vperm.xlu0 %469, %v604_v13  }
  0x46   : > { %232 = vperm.xlu1 %470, %v689_v30   ;;  %227 = vperm.xlu0 %469, %v684_v29  }
  0x4a   : > { %142 = vperm.xlu1 %470, %v619_v16   ;;  %137 = vperm.xlu0 %469, %v614_v15  }
  0x4e   : > { %242 = vperm.xlu1 %470, %v699_v32   ;;  %237 = vperm.xlu0 %469, %v694_v31  }
  0x52   : > { %279 = vperm.xlu0 %469, %v706_v34  }
  0x91   : > { %v168_v39 = vpop.permute.xlu1 %167  ;;  %v68_v40 = vpop.permute.xlu0 %67 }
  0x92   : > { %v149_v41 = vmul.f32 %v751_v38, %v68_v40 }
  0x94   : > { %v245_v44 = vadd.f32 %v168_v39, %v149_v41 }
  0x95   : > { %v173_v42 = vpop.permute.xlu1 %172  ;;  %v73_v43 = vpop.permute.xlu0 %72 }
  0x96   : > { %v150_v45 = vmul.f32 %v751_v38, %v73_v43  ;;  %v261_v49 = vmax.f32 %v245_v44, 0.0 }
  0x98   : > { %v246_v46 = vadd.f32 %v173_v42, %v150_v45 }
  0x99   : > { %v83_v47 = vpop.permute.xlu1 %82  ;;  %v78_v48 = vpop.permute.xlu0 %77 }
  0x9a   : > { %v262_v50 = vmax.f32 %v246_v46, 0.0  ;;  %v152_v51 = vmul.f32 %v751_v38, %v83_v47  ;;  %v151_v52 = vmul.f32 %v751_v38, %v78_v48 }
  0x9c   : > { %v433_v53 = vpack.c.bf16 %v262_v50, %v261_v49 }
  0x9d   : > { %v183_v54 = vpop.permute.xlu1 %182  ;;  %v178_v55 = vpop.permute.xlu0 %177 }
  0x9e   : > { %v248_v56 = vadd.f32 %v183_v54, %v152_v51  ;;  %v247_v57 = vadd.f32 %v178_v55, %v151_v52  ;;  %434 = vmatpush3.bf16.msra.mxu0 %v433_v53 }
  0x9f   : > { %435 = vmatprep.subr.bf16.mxu0 %v504_v36 }
  0xa0   : > { %v264_v58 = vmax.f32 %v248_v56, 0.0  ;;  %v263_v59 = vmax.f32 %v247_v57, 0.0 }
  0xa1   : > { %v93_v60 = vpop.permute.xlu1 %92  ;;  %v88_v61 = vpop.permute.xlu0 %87 }
  0xa2   : > { %v436_v62 = vpack.c.bf16 %v264_v58, %v263_v59  ;;  %v154_v63 = vmul.f32 %v751_v38, %v93_v60  ;;  %v153_v0 = vmul.f32 %v751_v38, %v88_v61 }
  0xa4   : > { %437 = vmatpush3.bf16.msra.mxu0 %v436_v62 }
  0xa5   : > { %v193_v35 = vpop.permute.xlu1 %192  ;;  %v188_v37 = vpop.permute.xlu0 %187  ;;  %438 = vmatprep.subr.bf16.mxu0 %v504_v36 }
  0xa6   : > { %v250_v39 = vadd.f32 %v193_v35, %v154_v63  ;;  %v249_v40 = vadd.f32 %v188_v37, %v153_v0 }
  0xa8   : > { %v266_v41 = vmax.f32 %v250_v39, 0.0  ;;  %v265_v42 = vmax.f32 %v249_v40, 0.0 }
  0xa9   : > { %v103_v43 = vpop.permute.xlu1 %102  ;;  %v98_v44 = vpop.permute.xlu0 %97 }
  0xaa   : > { %v439_v45 = vpack.c.bf16 %v266_v41, %v265_v42  ;;  %v156_v46 = vmul.f32 %v751_v38, %v103_v43  ;;  %v155_v47 = vmul.f32 %v751_v38, %v98_v44 }
  0xac   : > { %440 = vmatpush3.bf16.msra.mxu0 %v439_v45 }
  0xad   : > { %v203_v48 = vpop.permute.xlu1 %202  ;;  %v198_v49 = vpop.permute.xlu0 %197  ;;  %441 = vmatprep.subr.bf16.mxu0 %v504_v36 }
  0xae   : > { %v252_v50 = vadd.f32 %v203_v48, %v156_v46  ;;  %v251_v51 = vadd.f32 %v198_v49, %v155_v47 }
  0xb0   : > { %v268_v52 = vmax.f32 %v252_v50, 0.0  ;;  %v267_v53 = vmax.f32 %v251_v51, 0.0 }
  0xb1   : > { %v113_v54 = vpop.permute.xlu1 %112  ;;  %v108_v55 = vpop.permute.xlu0 %107 }
  0xb2   : > { %v442_v56 = vpack.c.bf16 %v268_v52, %v267_v53  ;;  %v158_v57 = vmul.f32 %v751_v38, %v113_v54  ;;  %v157_v58 = vmul.f32 %v751_v38, %v108_v55 }
  0xb4   : > { %443 = vmatpush3.bf16.msra.mxu0 %v442_v56 }
  0xb5   : > { %v213_v59 = vpop.permute.xlu1 %212  ;;  %v208_v60 = vpop.permute.xlu0 %207  ;;  %444 = vmatprep.subr.bf16.mxu0 %v504_v36 }
  0xb6   : > { %v254_v61 = vadd.f32 %v213_v59, %v158_v57  ;;  %v253_v62 = vadd.f32 %v208_v60, %v157_v58 }
  0xb8   : > { %v270_v63 = vmax.f32 %v254_v61, 0.0  ;;  %v269_v0 = vmax.f32 %v253_v62, 0.0 }
  0xb9   : > { %v123_v35 = vpop.permute.xlu1 %122  ;;  %v118_v37 = vpop.permute.xlu0 %117 }
  0xba   : > { %v445_v39 = vpack.c.bf16 %v270_v63, %v269_v0  ;;  %v160_v40 = vmul.f32 %v751_v38, %v123_v35  ;;  %v159_v41 = vmul.f32 %v751_v38, %v118_v37 }
  0xbc   : > { %446 = vmatpush3.bf16.msra.mxu0 %v445_v39 }
  0xbd   : > { %v223_v42 = vpop.permute.xlu1 %222  ;;  %v218_v43 = vpop.permute.xlu0 %217  ;;  %447 = vmatprep.subr.bf16.mxu0 %v504_v36 }
  0xbe   : > { %v256_v44 = vadd.f32 %v223_v42, %v160_v40  ;;  %v255_v45 = vadd.f32 %v218_v43, %v159_v41  ;;  %v282_v43 = vlaneseq }
  0xc0   : > { %v272_v46 = vmax.f32 %v256_v44, 0.0  ;;  %v271_v47 = vmax.f32 %v255_v45, 0.0  ;;  %v283_v44 = vshrl.u32 %v282_v43, 7 }
  0xc1   : > { %v133_v48 = vpop.permute.xlu1 %132  ;;  %v128_v49 = vpop.permute.xlu0 %127 }
  0xc2   : > { %v448_v50 = vpack.c.bf16 %v272_v46, %v271_v47  ;;  %v162_v51 = vmul.f32 %v751_v38, %v133_v48  ;;  %v161_v52 = vmul.f32 %v751_v38, %v128_v49  ;;  %v284_v45 = vsub.s32 0, %v283_v44 }
  0xc4   : > { %449 = vmatpush3.bf16.msra.mxu0 %v448_v50 }
  0xc5   : > { %v233_v53 = vpop.permute.xlu1 %232  ;;  %v228_v54 = vpop.permute.xlu0 %227  ;;  %450 = vmatprep.subr.bf16.mxu0 %v504_v36 }
  0xc6   : > { %v258_v55 = vadd.f32 %v233_v53, %v162_v51  ;;  %v257_v56 = vadd.f32 %v228_v54, %v161_v52 }
  0xc8   : > { %v274_v57 = vmax.f32 %v258_v55, 0.0  ;;  %v273_v58 = vmax.f32 %v257_v56, 0.0 }
  0xc9   : > { %v143_v59 = vpop.permute.xlu1 %142  ;;  %v138_v60 = vpop.permute.xlu0 %137 }
  0xca   : > { %v451_v61 = vpack.c.bf16 %v274_v57, %v273_v58  ;;  %v164_v62 = vmul.f32 %v751_v38, %v143_v59  ;;  %v163_v63 = vmul.f32 %v751_v38, %v138_v60 }
  0xcc   : > { %452 = vmatpush3.bf16.msra.mxu0 %v451_v61 }
  0xcd   : > { %v243_v0 = vpop.permute.xlu1 %242  ;;  %v238_v35 = vpop.permute.xlu0 %237  ;;  %453 = vmatprep.subr.bf16.mxu0 %v504_v36 }
  0xce   : > { %v260_v37 = vadd.f32 %v243_v0, %v164_v62  ;;  %v259_v39 = vadd.f32 %v238_v35, %v163_v63 }
  0xd0   : > { %v276_v40 = vmax.f32 %v260_v37, 0.0  ;;  %v275_v41 = vmax.f32 %v259_v39, 0.0 }
  0xd1   : > { %v280_v46 = vpop.permute.xlu0 %279 }
  0xd2   : > { %v454_v42 = vpack.c.bf16 %v276_v40, %v275_v41  ;;  %v285_v47 = vrot.slane %v280_v46, %v284_v45 }
  0xd4   : > { %455 = vmatpush3.bf16.msra.mxu0 %v454_v42 }
  0xd7   : > { %430 = vmatmul.mubr.f32.vlgmr.msra.gmra.mrb[0].mxu0 %v704_v33 }
 0x1a7   :  { %61 = sbr.rel (!%p59_p0) target bundleno = 16 (0x10), region = 49 }
 0x1aa   : > { %v352_v38 = vpop.f32.mrb[0].mxu0 }
 0x1ab   : > { %v353_v48 = vadd.f32 %v352_v38, %v285_v47  ;;  %v431_v49 = vpop.f32.mrb[1].mxu0 }
 0x1ad   : > { %357 = vst [vmem:[%s356_s8] sm:$0x1] %v353_v48 }
 0x1ae   :  { %482 = shalt.err (!%p479_p5)
}
 0x1af   :  { %s483_s14 = scalar_lea.hbm %s798_s5, 128 }
 0x1b0   :  { %p484_p6 = scmp.ne.s32.totalorder %s798_s5, %s483_s14  ;;  %p487_p7 = scmp.lt.u32.totalorder %s483_s14, %s798_s5 }
 0x1b2   :  { %p489_p8 = pnand %p487_p7, %p484_p6 }
 0x1b4   :  { %492 = shalt.err (!%p489_p8)
}
 0x1b5   :  { %367 = dma.vmem_to_hbm [thread:$0]  %s365_s10, 128, %s798_s5, [#allocation4]  }
 0x1b6   :  { %497 = dma.done.wait [#allocation4], 128  }
 0x1b7   :  { %498 = vsyncadd [#allocation4], 4294967168 }
 0x1b8   :  { %371 = vsyncpa [#allocation4], 1 }

</bundles_post_ra>
